<compile_context>
chip_gen: v5e
topology: v5e:2x2
jax: 0.10.0
libtpu: 0.0.40
codegen_flags: <defaults>
</compile_context>

<pallas_src>
import jax
import jax.numpy as jnp
from jax import lax
from jax.experimental import pallas as pl
from jax.experimental.pallas import tpu as pltpu

BN_EPS = 1e-5
ACT_DTYPE = jnp.bfloat16      # inter-layer storage / MXU operand dtype
_LANE = 128


# --------------------------------------------------------------------------
# pltpu.roll direction probe (resolved once, outside any kernel trace)
# --------------------------------------------------------------------------
_ROLL_JNP_CONVENTION = None


def _roll_probe_kernel(x_ref, o_ref):
    o_ref[...] = pltpu.roll(x_ref[...], shift=1, axis=1)


def _roll_matches_jnp():
    """True iff pltpu.roll(x, s, axis) == jnp.roll(x, s, axis)."""
    global _ROLL_JNP_CONVENTION
    if _ROLL_JNP_CONVENTION is None:
        x = jnp.arange(_LANE, dtype=jnp.float32).reshape(1, _LANE)
        y = pl.pallas_call(
            _roll_probe_kernel,
            out_shape=jax.ShapeDtypeStruct((1, _LANE), jnp.float32),
        )(x)
        v = float(jax.device_get(y)[0, 0])
        if v == float(_LANE - 1):
            _ROLL_JNP_CONVENTION = True
        elif v == 1.0:
            _ROLL_JNP_CONVENTION = False
        else:
            raise RuntimeError(f"unexpected pltpu.roll semantics (probe={v})")
    return _ROLL_JNP_CONVENTION


def _shift_left(v, off, ncols):
    """Return v shifted so that out[:, j] == v[:, j + off] (tail cols are junk)."""
    if off == 0:
        return v
    amt = (ncols - off) if _roll_matches_jnp() else off
    return pltpu.roll(v, shift=amt, axis=1)


# --------------------------------------------------------------------------
# plain-JAX glue: spatial pad + phase decomposition (1x activation volume,
# replaces the old 9x-49x im2col inflation)
# --------------------------------------------------------------------------
def _ceil_div(a, b):
    return -(-a // b)


def _round_up(a, b):
    return _ceil_div(a, b) * b


def _phase_pack(x_canon, geom, k, stride, pad, fill=0.0):
    """Pad + phase-decompose a [C, B*H*W] activation for a k x k / stride conv.

    Returns (phases [P, C, ncols], taps, (Hq, Wq, Ho, Wo, ncols)) where each tap
    is (phase_index, column_offset, di, dj).  Tap (p, off) contributes
    x_phase[p][:, col + off] to output column `col` of the (Hq, Wq) phase grid;
    only columns with hq < Ho and wq < Wo are valid output pixels.
    """
    B, H, W = geom
    C = x_canon.shape[0]
    x4 = x_canon.reshape(C, B, H, W)
    if pad:
        x4 = jnp.pad(x4, ((0, 0), (0, 0), (pad, pad), (pad, pad)),
                     constant_values=fill)
    Hp, Wp = H + 2 * pad, W + 2 * pad
    Ho = (Hp - k) // stride + 1
    Wo = (Wp - k) // stride + 1
    Hq, Wq = _ceil_div(Hp, stride), _ceil_div(Wp, stride)
    npix = B * Hq * Wq
    ncols = _round_up(npix, _LANE)

    phases, taps = [], []
    for pi in range(min(stride, k)):
        for pj in range(min(stride, k)):
            ph = x4[:, :, pi::stride, pj::stride]
            ph = jnp.pad(ph, ((0, 0), (0, 0),
                              (0, Hq - ph.shape[2]), (0, Wq - ph.shape[3])),
                         constant_values=fill)
            ph = ph.reshape(C, npix)
            ph = jnp.pad(ph, ((0, 0), (0, ncols - npix)), constant_values=fill)
            p_idx = len(phases)
            phases.append(ph)
            for ai in range(_ceil_div(k - pi, stride)):
                for aj in range(_ceil_div(k - pj, stride)):
                    taps.append((p_idx, ai * Wq + aj,
                                 stride * ai + pi, stride * aj + pj))
    return jnp.stack(phases, axis=0), taps, (Hq, Wq, Ho, Wo, ncols)


def _valid_mask(B, Hq, Wq, Ho, Wo, ncols):
    """[1, ncols] f32 mask of valid output pixels on the phase grid."""
    m = jnp.zeros((B, Hq, Wq), jnp.float32).at[:, :Ho, :Wo].set(1.0)
    m = m.reshape(1, B * Hq * Wq)
    return jnp.pad(m, ((0, 0), (0, ncols - B * Hq * Wq)))


# --------------------------------------------------------------------------
# Pallas kernels
# --------------------------------------------------------------------------
def _make_conv_bn_kernel(taps, ncols, inv_count, relu, has_res):
    """Fused implicit-GEMM conv + train-mode BN [+ residual] [+ ReLU]."""
    by_phase = {}
    for t, (p, off, _, _) in enumerate(taps):
        by_phase.setdefault(p, []).append((t, off))

    def kernel(*refs):
        if has_res:
            x_ref, w_ref, g_ref, b_ref, m_ref, r_ref, o_ref = refs
        else:
            x_ref, w_ref, g_ref, b_ref, m_ref, o_ref = refs
        co = o_ref.shape[0]
        acc = jnp.zeros((co, ncols), jnp.float32)
        for p, tap_list in by_phase.items():
            # Upcast once per phase: the lane shift (XLU roll) runs on 32-bit
            # data (conservative wrt packed-dtype rotates); operands are cast
            # back to bf16 right before the MXU.
            xp = x_ref[p].astype(jnp.float32)
            for t, off in tap_list:
                xs = _shift_left(xp, off, ncols).astype(w_ref.dtype)
                acc = acc + jnp.dot(w_ref[t], xs,
                                    preferred_element_type=jnp.float32)
        # train-mode BatchNorm2d over the valid output pixels (biased variance)
        m = m_ref[...]
        mean = jnp.sum(acc * m, axis=1, keepdims=True) * inv_count
        cen = (acc - mean) * m
        var = jnp.sum(cen * cen, axis=1, keepdims=True) * inv_count
        y = (acc - mean) * lax.rsqrt(var + BN_EPS) * g_ref[...] + b_ref[...]
        if has_res:
            y = y + r_ref[...].astype(jnp.float32)
        if relu:
            y = jnp.maximum(y, 0.0)
        o_ref[...] = y.astype(o_ref.dtype)

    return kernel


def _make_pool_kernel(taps, ncols):
    """3x3 max pooling as max over the (phase, tap) shifted views."""
    by_phase = {}
    for p, off, _, _ in taps:
        by_phase.setdefault(p, []).append(off)

    def kernel(x_ref, o_ref):
        out = None
        for p, offs in by_phase.items():
            xp = x_ref[p].astype(jnp.float32)
            for off in offs:
                xs = _shift_left(xp, off, ncols)
                out = xs if out is None else jnp.maximum(out, xs)
        o_ref[...] = out.astype(o_ref.dtype)

    return kernel


def _head_kernel(x_ref, w1_ref, g_ref, b_ref, w2_ref, b2_ref, avg_ref,
                 pooled_ref, proj_ref, projg_ref):
    """Fused projector (1x1 conv -> BN -> ReLU -> 1x1 conv + bias) + both
    global average pools (encoder adaptive_avg_pool2d and projected mean)."""
    xv = x_ref[...]                                                    # [feat, M]
    h = jnp.dot(w1_ref[...], xv, preferred_element_type=jnp.float32)   # [joint, M]
    mean = jnp.mean(h, axis=1, keepdims=True)
    var = jnp.mean((h - mean) ** 2, axis=1, keepdims=True)
    hn = (h - mean) * lax.rsqrt(var + BN_EPS) * g_ref[...] + b_ref[...]
    hr = jnp.maximum(hn, 0.0)
    p = jnp.dot(w2_ref[...], hr.astype(w2_ref.dtype),
                preferred_element_type=jnp.float32) + b2_ref[...]       # [joint, M]
    proj_ref[...] = p
    avg = avg_ref[...]                                                  # [M, B]
    pooled_ref[...] = jnp.dot(xv.astype(jnp.float32), avg,
                              preferred_element_type=jnp.float32)       # [feat, B]
    projg_ref[...] = jnp.dot(p, avg, preferred_element_type=jnp.float32)  # [joint, B]


# --------------------------------------------------------------------------
# wrappers
# --------------------------------------------------------------------------
def conv_bn(x_canon, geom, w, gamma, beta, *, stride=1, pad=0, relu=True,
            residual=None):
    """Conv2d(bias=False) + BatchNorm2d(batch stats) [+ residual] [+ ReLU].

    x_canon : [Cin, B*H*W] activation (channel-major, pixels on lanes).
    w       : [Cout, Cin, k, k] float32 (PyTorch layout).
    residual: optional [Cout, B*Ho*Wo] activation added before the ReLU.
    Returns (out [Cout, B*Ho*Wo] bf16, (B, Ho, Wo)).
    """
    _roll_matches_jnp()
    B, H, W = geom
    Cout, Cin, k, _ = w.shape
    xs, taps, (Hq, Wq, Ho, Wo, ncols) = _phase_pack(
        x_canon.astype(ACT_DTYPE), geom, k, stride, pad, fill=0.0)
    P, T = xs.shape[0], len(taps)
    wT = jnp.stack([w[:, :, di, dj] for (_, _, di, dj) in taps],
                   axis=0).astype(ACT_DTYPE)                        # [T, Cout, Cin]
    mask = _valid_mask(B, Hq, Wq, Ho, Wo, ncols)
    g = gamma.reshape(Cout, 1).astype(jnp.float32)
    b = beta.reshape(Cout, 1).astype(jnp.float32)

    co_tile = min(Cout, 32)                 # channel-parallel grid (megacore-ready)
    grid = (Cout // co_tile,)

    inputs = [xs, wT, g, b, mask]
    in_specs = [
        pl.BlockSpec((P, Cin, ncols), lambda j: (0, 0, 0)),
        pl.BlockSpec((T, co_tile, Cin), lambda j: (0, j, 0)),
        pl.BlockSpec((co_tile, 1), lambda j: (j, 0)),
        pl.BlockSpec((co_tile, 1), lambda j: (j, 0)),
        pl.BlockSpec((1, ncols), lambda j: (0, 0)),
    ]
    has_res = residual is not None
    if has_res:
        r = residual.astype(ACT_DTYPE).reshape(Cout, B, Ho, Wo)
        r = jnp.pad(r, ((0, 0), (0, 0), (0, Hq - Ho), (0, Wq - Wo)))
        r = r.reshape(Cout, B * Hq * Wq)
        r = jnp.pad(r, ((0, 0), (0, ncols - B * Hq * Wq)))
        inputs.append(r)
        in_specs.append(pl.BlockSpec((co_tile, ncols), lambda j: (j, 0)))

    kernel = _make_conv_bn_kernel(taps, ncols, 1.0 / (B * Ho * Wo), relu, has_res)
    flops = 2 * T * Cin * Cout * ncols
    bytes_accessed = sum(int(a.size) * a.dtype.itemsize for a in inputs) \
        + Cout * ncols * 2

    out = pl.pallas_call(
        kernel,
        grid=grid,
        out_shape=jax.ShapeDtypeStruct((Cout, ncols), ACT_DTYPE),
        in_specs=in_specs,
        out_specs=pl.BlockSpec((co_tile, ncols), lambda j: (j, 0)),
        compiler_params=pltpu.CompilerParams(
            dimension_semantics=("parallel",),
            vmem_limit_bytes=32 * 1024 * 1024),
        cost_estimate=pl.CostEstimate(flops=flops, transcendentals=0,
                                      bytes_accessed=bytes_accessed),
    )(*inputs)

    out = out[:, :B * Hq * Wq].reshape(Cout, B, Hq, Wq)[:, :, :Ho, :Wo]
    return out.reshape(Cout, B * Ho * Wo), (B, Ho, Wo)


def maxpool_3x3_s2_p1(x_canon, geom):
    """MaxPool2d(kernel=3, stride=2, padding=1) on a [C, B*H*W] activation."""
    _roll_matches_jnp()
    B, H, W = geom
    C = x_canon.shape[0]
    xs, taps, (Hq, Wq, Ho, Wo, ncols) = _phase_pack(
        x_canon.astype(ACT_DTYPE), geom, 3, 2, 1, fill=-jnp.inf)
    P = xs.shape[0]
    c_tile = min(C, 32)
    out = pl.pallas_call(
        _make_pool_kernel(taps, ncols),
        grid=(C // c_tile,),
        out_shape=jax.ShapeDtypeStruct((C, ncols), ACT_DTYPE),
        in_specs=[pl.BlockSpec((P, c_tile, ncols), lambda j: (0, j, 0))],
        out_specs=pl.BlockSpec((c_tile, ncols), lambda j: (j, 0)),
        compiler_params=pltpu.CompilerParams(
            dimension_semantics=("parallel",),
            vmem_limit_bytes=32 * 1024 * 1024),
    )(xs)
    out = out[:, :B * Hq * Wq].reshape(C, B, Hq, Wq)[:, :, :Ho, :Wo]
    return out.reshape(C, B * Ho * Wo), (B, Ho, Wo)


# --------------------------------------------------------------------------
# Synthetic deterministic parameters (ResNet-18 topology, width-scaled)
# --------------------------------------------------------------------------
def _conv_init(key, cout, cin, k):
    fan_in = cin * k * k
    return jax.random.normal(key, (cout, cin, k, k), jnp.float32) * (2.0 / fan_in) ** 0.5


def init_params(key, in_ch=3, widths=(8, 16, 32, 64), blocks=(2, 2, 2, 2), joint=32):
    keys = iter(jax.random.split(key, 64))
    p = {
        "stem_w": _conv_init(next(keys), widths[0], in_ch, 7),
        "stem_g": jnp.ones((widths[0],), jnp.float32),
        "stem_b": jnp.zeros((widths[0],), jnp.float32),
        "layers": [],
    }
    cin = widths[0]
    for li, (w, nb) in enumerate(zip(widths, blocks)):
        layer = []
        for bi in range(nb):
            stride = 2 if (li > 0 and bi == 0) else 1
            blk = {
                "stride": stride,
                "conv1": _conv_init(next(keys), w, cin, 3),
                "bn1_g": jnp.ones((w,), jnp.float32), "bn1_b": jnp.zeros((w,), jnp.float32),
                "conv2": _conv_init(next(keys), w, w, 3),
                "bn2_g": jnp.ones((w,), jnp.float32), "bn2_b": jnp.zeros((w,), jnp.float32),
            }
            if stride != 1 or cin != w:
                blk["ds_w"] = _conv_init(next(keys), w, cin, 1)
                blk["ds_g"] = jnp.ones((w,), jnp.float32)
                blk["ds_b"] = jnp.zeros((w,), jnp.float32)
            layer.append(blk)
            cin = w
        p["layers"].append(layer)
    feat = widths[-1]                       # == get_encoder_output_dim(encoder)
    p["proj1_w"] = _conv_init(next(keys), joint, feat, 1)      # Conv1x1, bias=False
    p["proj_bn_g"] = jnp.ones((joint,), jnp.float32)
    p["proj_bn_b"] = jnp.zeros((joint,), jnp.float32)
    p["proj2_w"] = _conv_init(next(keys), joint, joint, 1)     # Conv1x1, bias=True
    p["proj2_bias"] = jnp.zeros((joint,), jnp.float32)
    return p


# --------------------------------------------------------------------------
# forward pass == ImageModel.forward
# --------------------------------------------------------------------------
def _basic_block(x, geom, blk):
    identity = x
    out, g1 = conv_bn(x, geom, blk["conv1"], blk["bn1_g"], blk["bn1_b"],
                      stride=blk["stride"], pad=1, relu=True)
    if "ds_w" in blk:
        identity, _ = conv_bn(x, geom, blk["ds_w"], blk["ds_g"], blk["ds_b"],
                              stride=blk["stride"], pad=0, relu=False)
    # second conv: BN -> (+ identity) -> ReLU, all fused into the same kernel
    out, g2 = conv_bn(out, g1, blk["conv2"], blk["bn2_g"], blk["bn2_b"],
                      stride=1, pad=1, relu=True, residual=identity)
    return out, g2


def image_model_forward(params, x):
    B, Cin, H, W = x.shape
    # single boundary transpose: NCHW -> channel-major [C, B*H*W]
    h = x.transpose(1, 0, 2, 3).reshape(Cin, B * H * W).astype(ACT_DTYPE)
    geom = (B, H, W)

    # --- encoder trunk (ImageEncoder.forward, return_patch_embeddings=True) ---
    h, geom = conv_bn(h, geom, params["stem_w"], params["stem_g"], params["stem_b"],
                      stride=2, pad=3, relu=True)
    h, geom = maxpool_3x3_s2_p1(h, geom)
    for layer in params["layers"]:
        for blk in layer:
            h, geom = _basic_block(h, geom, blk)
    patch = h                                          # [feat, B*h*w] bf16
    B_, Hh, Ww = geom
    feat = patch.shape[0]
    npix = Hh * Ww
    joint = params["proj1_w"].shape[0]

    # --- projector + both global average pools, fused in one head kernel ---
    w1 = params["proj1_w"].reshape(joint, feat).astype(ACT_DTYPE)
    w2 = params["proj2_w"].reshape(joint, joint).astype(ACT_DTYPE)
    g1 = params["proj_bn_g"].reshape(joint, 1).astype(jnp.float32)
    b1 = params["proj_bn_b"].reshape(joint, 1).astype(jnp.float32)
    b2 = params["proj2_bias"].reshape(joint, 1).astype(jnp.float32)
    avg = jnp.repeat(jnp.eye(B_, dtype=jnp.float32), npix, axis=0) / float(npix)
    pooled, proj_patch, proj_global = pl.pallas_call(
        _head_kernel,
        out_shape=(jax.ShapeDtypeStruct((feat, B_), jnp.float32),
                   jax.ShapeDtypeStruct((joint, B_ * npix), jnp.float32),
                   jax.ShapeDtypeStruct((joint, B_), jnp.float32)),
    )(patch, w1, g1, b1, w2, b2, avg)

    # --- module-boundary conversions back to reference NCHW / f32 layout ---
    patch_x = patch.astype(jnp.float32).reshape(feat, B_, Hh, Ww).transpose(1, 0, 2, 3)
    proj_patch_x = proj_patch.reshape(joint, B_, Hh, Ww).transpose(1, 0, 2, 3)

    # Dropout(0.1)(pooled_x) only feeds the downstream classifier, which is None
    # in the default config, so it does not influence any returned tensor.
    # TODO(synk): classifier (MultiTaskModel) and the guided global_pooler are
    # not instantiated in the reference default config -> class_logits and
    # pool_weights stay None.
    return {
        "img_embedding": pooled.T,                     # [B, feat]
        "patch_embedding": patch_x,                    # [B, feat, h, w]
        "projected_patch_embeddings": proj_patch_x,    # [B, joint, h, w]
        "projected_global_embedding": proj_global.T,   # [B, joint]
        "class_logits": None,
        "pool_weights": None,
    }


# --------------------------------------------------------------------------
# self-checks of the implicit-GEMM machinery against pure-JAX references
# --------------------------------------------------------------------------
def _to_canon(x_nchw):
    B, C, H, W = x_nchw.shape
    return x_nchw.transpose(1, 0, 2, 3).reshape(C, B * H * W), (B, H, W)


def _from_canon(x_canon, geom):
    B, H, W = geom
    C = x_canon.shape[0]
    return x_canon.reshape(C, B, H, W).transpose(1, 0, 2, 3)


def _ref_conv_bn(x, w, gamma, beta, *, stride, pad, relu, residual=None):
    y = lax.conv_general_dilated(
        x.astype(ACT_DTYPE), w.astype(ACT_DTYPE),
        window_strides=(stride, stride), padding=((pad, pad), (pad, pad)),
        dimension_numbers=("NCHW", "OIHW", "NCHW"),
        preferred_element_type=jnp.float32)
    mu = jnp.mean(y, axis=(0, 2, 3), keepdims=True)
    var = jnp.mean((y - mu) ** 2, axis=(0, 2, 3), keepdims=True)
    y = (y - mu) * lax.rsqrt(var + BN_EPS) * gamma.reshape(1, -1, 1, 1) \
        + beta.reshape(1, -1, 1, 1)
    if residual is not None:
        y = y + residual.astype(ACT_DTYPE).astype(jnp.float32)
    if relu:
        y = jnp.maximum(y, 0.0)
    return y


def _ref_maxpool(x):
    xb = x.astype(ACT_DTYPE).astype(jnp.float32)
    return lax.reduce_window(xb, -jnp.inf, lax.max, (1, 1, 3, 3), (1, 1, 2, 2),
                             ((0, 0), (0, 0), (1, 1), (1, 1)))


def _self_check(key):
    k1, k2, k3, k4, k5 = jax.random.split(key, 5)

    # (a) strided 3x3 conv + BN + ReLU, Cout=64 (phase decomposition,
    #     channel-parallel grid, valid-pixel BN mask)
    x = jax.random.normal(k1, (2, 8, 16, 16), jnp.float32)
    w = jax.random.normal(k2, (64, 8, 3, 3), jnp.float32) * 0.2
    gamma = jnp.full((64,), 1.5, jnp.float32)
    beta = jnp.full((64,), 0.1, jnp.float32)
    xc, geom = _to_canon(x)
    out, og = conv_bn(xc, geom, w, gamma, beta, stride=2, pad=1, relu=True)
    got = _from_canon(out.astype(jnp.float32), og)
    want = _ref_conv_bn(x, w, gamma, beta, stride=2, pad=1, relu=True)
    assert jnp.allclose(got, want, atol=5e-2, rtol=5e-2), \
        float(jnp.max(jnp.abs(got - want)))

    # (b) stride-1 3x3 conv with fused residual add + ReLU
    x = jax.random.normal(k3, (2, 16, 8, 8), jnp.float32)
    w = jax.random.normal(k4, (16, 16, 3, 3), jnp.float32) * 0.1
    res = jax.random.normal(k5, (2, 16, 8, 8), jnp.float32)
    gamma = jnp.ones((16,), jnp.float32)
    beta = jnp.zeros((16,), jnp.float32)
    xc, geom = _to_canon(x)
    rc, _ = _to_canon(res)
    out, og = conv_bn(xc, geom, w, gamma, beta, stride=1, pad=1, relu=True,
                      residual=rc)
    got = _from_canon(out.astype(jnp.float32), og)
    want = _ref_conv_bn(x, w, gamma, beta, stride=1, pad=1, relu=True,
                        residual=res)
    assert jnp.allclose(got, want, atol=5e-2, rtol=5e-2), \
        float(jnp.max(jnp.abs(got - want)))

    # (c) 3x3 / stride 2 / pad 1 max pooling
    x = jax.random.normal(k1, (2, 8, 16, 16), jnp.float32)
    xc, geom = _to_canon(x)
    out, og = maxpool_3x3_s2_p1(xc.astype(ACT_DTYPE), geom)
    got = _from_canon(out.astype(jnp.float32), og)
    want = _ref_maxpool(x)
    assert jnp.allclose(got, want, atol=1e-6), \
        float(jnp.max(jnp.abs(got - want)))


# --------------------------------------------------------------------------
if __name__ == "__main__":
    _roll_matches_jnp()          # resolve pltpu.roll direction before tracing

    key = jax.random.PRNGKey(0)
    pkey, xkey, ckey = jax.random.split(key, 3)

    _self_check(ckey)            # verify the implicit-GEMM conv / pool kernels

    params = init_params(pkey, joint=32)
    x = jax.random.normal(xkey, (2, 3, 64, 64), jnp.float32)   # small NCHW batch

    forward = jax.jit(lambda inp: image_model_forward(params, inp))
    out = forward(x)
    jax.block_until_ready(out)

    assert out["img_embedding"].shape == (2, 64)
    assert out["patch_embedding"].shape == (2, 64, 2, 2)
    assert out["projected_patch_embeddings"].shape == (2, 32, 2, 2)
    assert out["projected_global_embedding"].shape == (2, 32)
    assert out["class_logits"] is None and out["pool_weights"] is None
    assert all(bool(jnp.isfinite(v).all()) for v in
               (out["img_embedding"], out["patch_embedding"],
                out["projected_patch_embeddings"],
                out["projected_global_embedding"]))

    print("KERNEL_OK")
</pallas_src>

<mosaic_0001>
module attributes {stable_mosaic.version = 11 : i64} {
  func.func @_roll_probe_kernel(%arg0: memref<1x128xf32, #tpu.memory_space<vmem>>, %arg1: memref<1x128xf32, #tpu.memory_space<vmem>>) attributes {dimension_semantics = [], scalar_prefetch = 0 : i64, scratch_operands = 0 : i64, tpu.core_type = #tpu.core_type<tc>} {
    %c0 = arith.constant 0 : index
    %c0_0 = arith.constant 0 : index
    %0 = vector.load %arg0[%c0, %c0_0] : memref<1x128xf32, #tpu.memory_space<vmem>>, vector<1x128xf32>
    %c1_i32 = arith.constant 1 : i32
    %1 = tpu.dynamic_rotate %0 by %c1_i32 dim 1 : vector<1x128xf32>, i32 -> vector<1x128xf32>
    %c0_1 = arith.constant 0 : index
    %c0_2 = arith.constant 0 : index
    %2 = vector.load %arg1[%c0_1, %c0_2] : memref<1x128xf32, #tpu.memory_space<vmem>>, vector<1x128xf32>
    tpu.vector_store %arg1[%c0_1, %c0_2], %1 {strides = array<i32>} : memref<1x128xf32, #tpu.memory_space<vmem>>, vector<1x128xf32>,
    return
  }
}

</mosaic_0001>

<bundles_post_ra>
// kernel: tpu_custom_call.1
= control target key start
LH: loop header
LB: loop body
LE: loop exit
PB: predicated region body
PF: predicated region fallthrough
CT: control target
= control target key end

     0   :  { %6 = vsyncpa [#allocation3], 0  ;;  %s118_s0 = inlined_call_operand.hbm [shape: f32[1,128], index: 0, kind: input, shape index: {}]   ;;  %s119_s1 = inlined_call_operand.hbm [shape: f32[1,128], index: 1, kind: output, shape index: {}]  }
   0x1   :  { %7 = vsyncpa [#allocation4], 0  ;;  %s13_s8 = sshll.u32 %s118_s0, 4  ;;  %s99_s9 = smov [#allocation2]   ;;  %s14_s8 = int_to_ptr.hbm [resolvable:$true] %s13_s8 }
   0x2   :  { %s15_s10 = sshll.u32 %s99_s9, 4  ;;  %s16_s10 = int_to_ptr.vmem [resolvable:$true] %s15_s10 }
   0x3   :  { %18 = dma.hbm_to_vmem [thread:$0]  %s14_s8, 16, %s16_s10, [#allocation3]  }
   0x4   :  { %95 = dma.done.wait [#allocation3], 16  }
   0x5   :  { %96 = vsyncadd [#allocation3], 4294967280  ;;  %v23_v0 = vld [vmem:[#allocation2] sm:$0x1]  ;;  %s100_s11 = smov 1   ;;  %s101_s12 = smov [#allocation5]  }
   0x6   :  { %24 = vrot.lane.b32.xlu0 %v23_v0, %s100_s11  ;;  %s32_s13 = sshll.u32 %s101_s12, 4  ;;  %s34_s16 = sshll.u32 %s119_s1, 4  ;;  %s33_s13 = int_to_ptr.vmem [resolvable:$true] %s32_s13  ;;  %s35_s16 = int_to_ptr.hbm [resolvable:$true] %s34_s16 }
  0x78   :  { %v25_v1 = vpop.permute.xlu0 %24 }
  0x79   :  { %26 = vst [vmem:[#allocation5] sm:$0x1] %v25_v1 }
  0x7a   :  { %37 = dma.vmem_to_hbm [thread:$0]  %s33_s13, 16, %s35_s16, [#allocation4]  }
  0x7b   :  { %97 = dma.done.wait [#allocation4], 16  }
  0x7c   :  { %98 = vsyncadd [#allocation4], 4294967280 }
  0x7d   :  { %42 = vsyncpa [#allocation3], 1 }
  0x7e   :  { %43 = vsyncpa [#allocation4], 1 }

</bundles_post_ra>
